<compile_context>
chip_gen: v5e
topology: v5e:2x2
jax: 0.10.0
libtpu: 0.0.40
codegen_flags: <defaults>
</compile_context>

<pallas_src>
import functools
import math

import jax
import jax.numpy as jnp
from jax import lax
from jax.experimental import pallas as pl
from jax.experimental.pallas import tpu as pltpu


def _attn_kernel(dk_pad, xq_ref, xkv_ref, wq_ref, bq_ref, wkv_ref, bkv_ref,
                 out_ref, attn_ref):
    # Blocks: xq (1, Tq, D); xkv (1, S, D); wq (D, dk_pad); bq (1, dk_pad);
    #         wkv (D, 2*dk_pad); bkv (1, 2*dk_pad);
    #         out (1, Tq, dk_pad); attn (1, Tq, S).
    xq = xq_ref[0].astype(jnp.bfloat16)        # (Tq, D)  query-tile rows
    xkv = xkv_ref[0].astype(jnp.bfloat16)      # (S, D)   full key/value rows

    # Q projection for this query tile (1/sqrt(dk) already folded into wq/bq).
    q = jnp.dot(xq, wq_ref[...].astype(jnp.bfloat16),
                preferred_element_type=jnp.float32) + bq_ref[...]      # (Tq, dk_pad) f32

    # Fused K/V projection over the full key range for this batch element.
    kv = jnp.dot(xkv, wkv_ref[...].astype(jnp.bfloat16),
                 preferred_element_type=jnp.float32) + bkv_ref[...]    # (S, 2*dk_pad) f32
    k = kv[:, :dk_pad]      # lane-aligned slices (dk_pad % 128 == 0)
    v = kv[:, dk_pad:]

    # scores[i, j] = q[i, :] . k[j, :] -- contract last dims directly, no
    # explicit k.T (no XLU transpose); bf16 operands, f32 accumulation.
    scores = lax.dot_general(
        q.astype(jnp.bfloat16), k.astype(jnp.bfloat16),
        dimension_numbers=(((1,), (1,)), ((), ())),
        preferred_element_type=jnp.float32)                            # (Tq, S) f32

    # Numerically-stable softmax, all in f32; the divide goes to the EUP.
    m = jnp.max(scores, axis=-1, keepdims=True)
    e = jnp.exp(scores - m)
    denom = jnp.sum(e, axis=-1, keepdims=True)
    weights = e * pl.reciprocal(denom, approx=True)                    # (Tq, S) f32

    out = jnp.dot(weights.astype(jnp.bfloat16), v.astype(jnp.bfloat16),
                  preferred_element_type=jnp.float32)                  # (Tq, dk_pad) f32

    # Lane-dense direct stores (no flatten relayout): last dims are dk_pad
    # (128-multiple) and S (full dim / 128-multiple at realistic lengths).
    out_ref[0] = out.astype(out_ref.dtype)
    attn_ref[0] = weights.astype(attn_ref.dtype)


def _round_up(n, m):
    return ((n + m - 1) // m) * m


def _vmem_limit_bytes():
    """Generation-aware scoped-VMEM limit (v7x has only 64 MiB physical)."""
    try:
        cap = getattr(pltpu.get_tpu_info(), "vmem_capacity_bytes",
                      64 * 1024 * 1024)
    except Exception:  # pragma: no cover - conservative fallback
        cap = 64 * 1024 * 1024
    return min(cap // 2, 64 * 1024 * 1024)


def _pick_tq(S, D, dk_pad, vmem_limit_bytes):
    """Largest query tile (divisor of S, multiple of 8) whose per-step VMEM
    footprint (double-buffered pipeline blocks + live temporaries) fits a
    conservative fraction of the scoped VMEM limit."""
    f32 = 4

    def bytes_needed(tq):
        blocks = 2 * (tq * D + S * D + D * dk_pad + D * 2 * dk_pad
                      + 3 * dk_pad + tq * dk_pad + tq * S) * f32   # double-buffered I/O
        live = (tq * dk_pad + S * 2 * dk_pad + 4 * tq * S) * f32   # q, kv, scores/e/weights
        return blocks + live

    budget = int(0.6 * vmem_limit_bytes)
    candidates = sorted({t for t in range(8, S + 1, 8) if S % t == 0} | {S})
    best = candidates[0]
    for t in candidates:
        if bytes_needed(t) <= budget:
            best = t
    return best


def transformer_self_attention(x, wq, bq, wk, bk, wv, bv, dk,
                               attn_dtype=jnp.float32):
    """x: (B, S, D); wq/wk/wv: (D, dk) (pre-transposed nn.Linear weights);
    bq/bk/bv: (1, dk). Returns (output (B, S, dk), attn_weights (B, S, S))."""
    B, S, D = x.shape
    scale = 1.0 / math.sqrt(dk)
    dk_pad = max(128, _round_up(dk, 128))   # lane-align the head dimension

    def pad_cols(w, b):
        wpad = jnp.zeros((D, dk_pad), w.dtype).at[:, :dk].set(w)
        bpad = jnp.zeros((1, dk_pad), b.dtype).at[:, :dk].set(b)
        return wpad, bpad

    # Fold 1/sqrt(dk) into the Q columns ((Q*s) @ K^T == (Q @ K^T) * s); pack
    # K and V into one lane-aligned (D, 2*dk_pad) weight for a fused KV matmul.
    wq_p, bq_p = pad_cols(wq * scale, bq * scale)
    wk_p, bk_p = pad_cols(wk, bk)
    wv_p, bv_p = pad_cols(wv, bv)
    w_kv = jnp.concatenate([wk_p, wv_p], axis=1)    # (D, 2*dk_pad)
    b_kv = jnp.concatenate([bk_p, bv_p], axis=1)    # (1, 2*dk_pad)

    vmem_limit = _vmem_limit_bytes()
    Tq = _pick_tq(S, D, dk_pad, vmem_limit)
    nq = S // Tq

    kernel = functools.partial(_attn_kernel, dk_pad)

    out_pad, attn = pl.pallas_call(
        kernel,
        out_shape=(
            jax.ShapeDtypeStruct((B, S, dk_pad), jnp.float32),
            jax.ShapeDtypeStruct((B, S, S), attn_dtype),
        ),
        grid_spec=pltpu.PrefetchScalarGridSpec(
            num_scalar_prefetch=0,
            grid=(B, nq),
            in_specs=[
                pl.BlockSpec((1, Tq, D), lambda b, qi: (b, qi, 0)),    # x (query tile)
                pl.BlockSpec((1, S, D), lambda b, qi: (b, 0, 0)),      # x (full keys)
                pl.BlockSpec((D, dk_pad), lambda b, qi: (0, 0)),       # Wq (scaled, padded)
                pl.BlockSpec((1, dk_pad), lambda b, qi: (0, 0)),       # bq
                pl.BlockSpec((D, 2 * dk_pad), lambda b, qi: (0, 0)),   # [Wk | Wv]
                pl.BlockSpec((1, 2 * dk_pad), lambda b, qi: (0, 0)),   # [bk | bv]
            ],
            out_specs=[
                pl.BlockSpec((1, Tq, dk_pad), lambda b, qi: (b, qi, 0)),
                pl.BlockSpec((1, Tq, S), lambda b, qi: (b, qi, 0)),
            ],
        ),
        compiler_params=pltpu.CompilerParams(
            dimension_semantics=("parallel", "parallel"),
            vmem_limit_bytes=vmem_limit),
    )(x, x, wq_p, bq_p, w_kv, b_kv)

    return out_pad[:, :, :dk], attn


def _reference(x, wq, bq, wk, bk, wv, bv, dk):
    q = x @ wq + bq
    k = x @ wk + bk
    v = x @ wv + bv
    scores = jnp.einsum("bsd,btd->bst", q, k) / math.sqrt(dk)
    w = jax.nn.softmax(scores, axis=-1)
    return jnp.einsum("bst,btd->bsd", w, v), w


if __name__ == "__main__":
    # Small shapes consistent with the module's forward.
    B, S, D, DK = 2, 8, 32, 16

    key = jax.random.PRNGKey(0)
    kx, kq, kbq, kk, kbk, kv, kbv = jax.random.split(key, 7)

    x = jax.random.normal(kx, (B, S, D), dtype=jnp.float32)

    # Deterministic parameter init (shapes from nn.Linear(input_dim, dk)),
    # stored pre-transposed as (D, DK); biases as (1, DK).
    bound = 1.0 / math.sqrt(D)
    wq = jax.random.uniform(kq, (D, DK), jnp.float32, -bound, bound)
    bq = jax.random.uniform(kbq, (1, DK), jnp.float32, -bound, bound)
    wk = jax.random.uniform(kk, (D, DK), jnp.float32, -bound, bound)
    bk = jax.random.uniform(kbk, (1, DK), jnp.float32, -bound, bound)
    wv = jax.random.uniform(kv, (D, DK), jnp.float32, -bound, bound)
    bv = jax.random.uniform(kbv, (1, DK), jnp.float32, -bound, bound)

    out, attn = transformer_self_attention(x, wq, bq, wk, bk, wv, bv, DK)
    out = jax.block_until_ready(out)
    attn = jax.block_until_ready(attn)

    ref_out, ref_attn = _reference(x, wq, bq, wk, bk, wv, bv, DK)
    # Tolerance accounts for bf16 MXU operands (f32 accumulation) and the EUP
    # approximate reciprocal in the softmax divide.
    assert jnp.allclose(out, ref_out, atol=2e-2, rtol=2e-2), \
        float(jnp.max(jnp.abs(out - ref_out)))
    assert jnp.allclose(attn, ref_attn, atol=2e-2, rtol=2e-2), \
        float(jnp.max(jnp.abs(attn - ref_attn)))

    print("KERNEL_OK")
</pallas_src>

<mosaic_0001>
module attributes {stable_mosaic.version = 11 : i64} {
  func.func @_attn_kernel(%arg0: i32, %arg1: i32, %arg2: memref<1x8x32xf32, #tpu.memory_space<vmem>>, %arg3: memref<1x8x32xf32, #tpu.memory_space<vmem>>, %arg4: memref<32x128xf32, #tpu.memory_space<vmem>>, %arg5: memref<1x128xf32, #tpu.memory_space<vmem>>, %arg6: memref<32x256xf32, #tpu.memory_space<vmem>>, %arg7: memref<1x256xf32, #tpu.memory_space<vmem>>, %arg8: memref<1x8x128xf32, #tpu.memory_space<vmem>>, %arg9: memref<1x8x8xf32, #tpu.memory_space<vmem>>) attributes {dimension_semantics = [#tpu.dimension_semantics<parallel>, #tpu.dimension_semantics<parallel>], iteration_bounds = array<i64: 2, 1>, scalar_prefetch = 0 : i64, scratch_operands = 0 : i64, tpu.core_type = #tpu.core_type<tc>, window_params = [{transform_indices = @transform_0, window_bounds = array<i64: 1, 8, 32>}, {transform_indices = @transform_1, window_bounds = array<i64: 1, 8, 32>}, {pipeline_mode = #tpu.pipeline_mode<synchronous>, transform_indices = @transform_2, window_bounds = array<i64: 32, 128>}, {pipeline_mode = #tpu.pipeline_mode<synchronous>, transform_indices = @transform_3, window_bounds = array<i64: 1, 128>}, {pipeline_mode = #tpu.pipeline_mode<synchronous>, transform_indices = @transform_4, window_bounds = array<i64: 32, 256>}, {pipeline_mode = #tpu.pipeline_mode<synchronous>, transform_indices = @transform_5, window_bounds = array<i64: 1, 256>}, {transform_indices = @transform_6, window_bounds = array<i64: 1, 8, 128>}, {transform_indices = @transform_7, window_bounds = array<i64: 1, 8, 8>}]} {
    %c0 = arith.constant 0 : index
    %c0_0 = arith.constant 0 : index
    %c0_1 = arith.constant 0 : index
    %0 = vector.load %arg2[%c0, %c0_0, %c0_1] : memref<1x8x32xf32, #tpu.memory_space<vmem>>, vector<1x8x32xf32>
    %1 = vector.shape_cast %0 : vector<1x8x32xf32> to vector<8x32xf32>
    %2 = arith.truncf %1 : vector<8x32xf32> to vector<8x32xbf16>
    %c0_2 = arith.constant 0 : index
    %c0_3 = arith.constant 0 : index
    %c0_4 = arith.constant 0 : index
    %3 = vector.load %arg3[%c0_2, %c0_3, %c0_4] : memref<1x8x32xf32, #tpu.memory_space<vmem>>, vector<1x8x32xf32>
    %4 = vector.shape_cast %3 : vector<1x8x32xf32> to vector<8x32xf32>
    %5 = arith.truncf %4 : vector<8x32xf32> to vector<8x32xbf16>
    %c0_5 = arith.constant 0 : index
    %c0_6 = arith.constant 0 : index
    %6 = vector.load %arg4[%c0_5, %c0_6] : memref<32x128xf32, #tpu.memory_space<vmem>>, vector<32x128xf32>
    %7 = arith.truncf %6 : vector<32x128xf32> to vector<32x128xbf16>
    %cst = arith.constant dense<0.000000e+00> : vector<8x128xf32>
    %8 = tpu.matmul %2, %7, %cst {dimension_numbers = #tpu.dot_dimension_numbers<[1], [0], [0], [1], [0, 0, 1, 1], [], []>} : vector<8x32xbf16>, vector<32x128xbf16>, vector<8x128xf32> -> vector<8x128xf32>
    %c0_7 = arith.constant 0 : index
    %c0_8 = arith.constant 0 : index
    %9 = vector.load %arg5[%c0_7, %c0_8] : memref<1x128xf32, #tpu.memory_space<vmem>>, vector<1x128xf32>
    %10 = vector.broadcast %9 : vector<1x128xf32> to vector<8x128xf32>
    %11 = arith.addf %8, %10 : vector<8x128xf32>
    %c0_9 = arith.constant 0 : index
    %c0_10 = arith.constant 0 : index
    %12 = vector.load %arg6[%c0_9, %c0_10] : memref<32x256xf32, #tpu.memory_space<vmem>>, vector<32x256xf32>
    %13 = arith.truncf %12 : vector<32x256xf32> to vector<32x256xbf16>
    %cst_11 = arith.constant dense<0.000000e+00> : vector<8x256xf32>
    %14 = tpu.matmul %5, %13, %cst_11 {dimension_numbers = #tpu.dot_dimension_numbers<[1], [0], [0], [1], [0, 0, 1, 1], [], []>} : vector<8x32xbf16>, vector<32x256xbf16>, vector<8x256xf32> -> vector<8x256xf32>
    %c0_12 = arith.constant 0 : index
    %c0_13 = arith.constant 0 : index
    %15 = vector.load %arg7[%c0_12, %c0_13] : memref<1x256xf32, #tpu.memory_space<vmem>>, vector<1x256xf32>
    %16 = vector.broadcast %15 : vector<1x256xf32> to vector<8x256xf32>
    %17 = arith.addf %14, %16 : vector<8x256xf32>
    %18 = vector.extract_strided_slice %17 {offsets = [0, 0], sizes = [8, 128], strides = [1, 1]} : vector<8x256xf32> to vector<8x128xf32>
    %19 = vector.extract_strided_slice %17 {offsets = [0, 128], sizes = [8, 128], strides = [1, 1]} : vector<8x256xf32> to vector<8x128xf32>
    %20 = arith.truncf %11 : vector<8x128xf32> to vector<8x128xbf16>
    %21 = arith.truncf %18 : vector<8x128xf32> to vector<8x128xbf16>
    %cst_14 = arith.constant dense<0.000000e+00> : vector<8x8xf32>
    %22 = tpu.matmul %20, %21, %cst_14 {dimension_numbers = #tpu.dot_dimension_numbers<[1], [1], [0], [0], [0, 0, 1, 0], [], []>} : vector<8x128xbf16>, vector<8x128xbf16>, vector<8x8xf32> -> vector<8x8xf32>
    %cst_15 = arith.constant dense<0xFF800000> : vector<8xf32>
    %23 = vector.multi_reduction <maximumf>, %22, %cst_15 [1] : vector<8x8xf32> to vector<8xf32>
    %24 = vector.shape_cast %23 : vector<8xf32> to vector<8x1xf32>
    %25 = vector.broadcast %24 : vector<8x1xf32> to vector<8x8xf32>
    %26 = arith.subf %22, %25 : vector<8x8xf32>
    %27 = math.exp %26 : vector<8x8xf32>
    %cst_16 = arith.constant dense<0.000000e+00> : vector<8xf32>
    %28 = vector.multi_reduction <add>, %27, %cst_16 [1] : vector<8x8xf32> to vector<8xf32>
    %29 = vector.shape_cast %28 : vector<8xf32> to vector<8x1xf32>
    %30 = tpu.reciprocal %29 {approx = true} : vector<8x1xf32> -> vector<8x1xf32>
    %31 = vector.broadcast %30 : vector<8x1xf32> to vector<8x8xf32>
    %32 = arith.mulf %27, %31 : vector<8x8xf32>
    %33 = arith.truncf %32 : vector<8x8xf32> to vector<8x8xbf16>
    %34 = arith.truncf %19 : vector<8x128xf32> to vector<8x128xbf16>
    %cst_17 = arith.constant dense<0.000000e+00> : vector<8x128xf32>
    %35 = tpu.matmul %33, %34, %cst_17 {dimension_numbers = #tpu.dot_dimension_numbers<[1], [0], [0], [1], [0, 0, 1, 1], [], []>} : vector<8x8xbf16>, vector<8x128xbf16>, vector<8x128xf32> -> vector<8x128xf32>
    %c0_18 = arith.constant 0 : index
    %c0_19 = arith.constant 0 : index
    %c0_20 = arith.constant 0 : index
    %36 = vector.load %arg8[%c0_18, %c0_19, %c0_20] : memref<1x8x128xf32, #tpu.memory_space<vmem>>, vector<1x8x128xf32>
    %37 = vector.shape_cast %36 : vector<1x8x128xf32> to vector<8x128xf32>
    %38 = vector.shape_cast %35 : vector<8x128xf32> to vector<1x8x128xf32>
    tpu.vector_store %arg8[%c0_18, %c0_19, %c0_20], %38 {strides = array<i32>} : memref<1x8x128xf32, #tpu.memory_space<vmem>>, vector<1x8x128xf32>,
    %c0_21 = arith.constant 0 : index
    %c0_22 = arith.constant 0 : index
    %c0_23 = arith.constant 0 : index
    %39 = vector.load %arg9[%c0_21, %c0_22, %c0_23] : memref<1x8x8xf32, #tpu.memory_space<vmem>>, vector<1x8x8xf32>
    %40 = vector.shape_cast %39 : vector<1x8x8xf32> to vector<8x8xf32>
    %41 = vector.shape_cast %32 : vector<8x8xf32> to vector<1x8x8xf32>
    tpu.vector_store %arg9[%c0_21, %c0_22, %c0_23], %41 {strides = array<i32>} : memref<1x8x8xf32, #tpu.memory_space<vmem>>, vector<1x8x8xf32>,
    return
  }
  func.func @transform_0(%arg0: i32, %arg1: i32) -> (i32, i32, i32) {
    %c0_i32 = arith.constant 0 : i32
    %c0_i32_0 = arith.constant 0 : i32
    return %arg0, %arg1, %c0_i32 : i32, i32, i32
  }
  func.func @transform_1(%arg0: i32, %arg1: i32) -> (i32, i32, i32) {
    %c0_i32 = arith.constant 0 : i32
    %c0_i32_0 = arith.constant 0 : i32
    %c0_i32_1 = arith.constant 0 : i32
    return %arg0, %c0_i32, %c0_i32_0 : i32, i32, i32
  }
  func.func @transform_2(%arg0: i32, %arg1: i32) -> (i32, i32) {
    %c0_i32 = arith.constant 0 : i32
    %c0_i32_0 = arith.constant 0 : i32
    %c0_i32_1 = arith.constant 0 : i32
    return %c0_i32, %c0_i32_0 : i32, i32
  }
  func.func @transform_3(%arg0: i32, %arg1: i32) -> (i32, i32) {
    %c0_i32 = arith.constant 0 : i32
    %c0_i32_0 = arith.constant 0 : i32
    %c0_i32_1 = arith.constant 0 : i32
    return %c0_i32, %c0_i32_0 : i32, i32
  }
  func.func @transform_4(%arg0: i32, %arg1: i32) -> (i32, i32) {
    %c0_i32 = arith.constant 0 : i32
    %c0_i32_0 = arith.constant 0 : i32
    %c0_i32_1 = arith.constant 0 : i32
    return %c0_i32, %c0_i32_0 : i32, i32
  }
  func.func @transform_5(%arg0: i32, %arg1: i32) -> (i32, i32) {
    %c0_i32 = arith.constant 0 : i32
    %c0_i32_0 = arith.constant 0 : i32
    %c0_i32_1 = arith.constant 0 : i32
    return %c0_i32, %c0_i32_0 : i32, i32
  }
  func.func @transform_6(%arg0: i32, %arg1: i32) -> (i32, i32, i32) {
    %c0_i32 = arith.constant 0 : i32
    %c0_i32_0 = arith.constant 0 : i32
    return %arg0, %arg1, %c0_i32 : i32, i32, i32
  }
  func.func @transform_7(%arg0: i32, %arg1: i32) -> (i32, i32, i32) {
    %c0_i32 = arith.constant 0 : i32
    %c0_i32_0 = arith.constant 0 : i32
    return %arg0, %arg1, %c0_i32 : i32, i32, i32
  }
}

</mosaic_0001>

<bundles_post_ra>
// kernel: tpu_custom_call.1
= control target key start
LH: loop header
LB: loop body
LE: loop exit
PB: predicated region body
PF: predicated region fallthrough
CT: control target
= control target key end

     0   :  { %s1336_s0 = inlined_call_operand.hbm [shape: f32[2,8,32], index: 0, kind: input, shape index: {}]   ;;  %s1337_s1 = inlined_call_operand.hbm [shape: f32[2,8,32], index: 1, kind: input, shape index: {}]   ;;  %s1338_s2 = inlined_call_operand.hbm [shape: f32[32,128], index: 2, kind: input, shape index: {}]   ;;  %s1339_s3 = inlined_call_operand.vmem [shape: f32[1,128], index: 3, kind: input, shape index: {}]   ;;  %s1340_s4 = inlined_call_operand.hbm [shape: f32[32,256], index: 4, kind: input, shape index: {}]   ;;  %s1341_s5 = inlined_call_operand.vmem [shape: f32[1,256], index: 5, kind: input, shape index: {}]   ;;  %s1342_s6 = inlined_call_operand.hbm [shape: f32[2,8,128], index: 6, kind: output, shape index: {0}]   ;;  %s1343_s7 = inlined_call_operand.hbm [shape: f32[2,8,8], index: 7, kind: output, shape index: {1}]  }
   0x1   :  { %1349 = sst [smem:[#allocation25_spill]] %s1338_s2 }
   0x2   :  { %1350 = sst [smem:[#allocation26_spill]] %s1340_s4 }
   0x3   :  { %13 = vsyncpa [#allocation3], 0 }
   0x4   :  { %15 = vsyncpa [#allocation3 + $0x1], 0 }
   0x5   :  { %16 = vsyncpa [#allocation6], 0 }
   0x6   :  { %18 = vsyncpa [#allocation6 + $0x1], 0 }
   0x7   :  { %19 = vsyncpa [#allocation9], 0 }
   0x8   :  { %20 = vsyncpa [#allocation4], 0 }
   0x9   :  { %22 = vsyncpa [#allocation4 + $0x1], 0 }
   0xa   :  { %23 = vsyncpa [#allocation12], 0 }
   0xb   :  { %25 = vsyncpa [#allocation12 + $0x1], 0  ;;  %s1144_s24 = smov 0   ;;  %s1146_s25 = smov 0  }
   0xc   :  { %s1148_s26 = smov 0   ;;  %s1150_s27 = smov 0  }
   0xd   :  { %s1152_s28 = smov 0   ;;  %s1154_s29 = smov 0  }
   0xe LB: > { %1351 = sst [smem:[#allocation19_spill]] %s1076_s24  ;;  %s1175_s30 = sadd.s32 4294967295, %s1096_s29   ;;  %s1096_s29 = sphi %s1154_s29, %s31_s29   ;;  %s1092_s28 = sphi %s1152_s28, %s1369_s28   ;;  %s1088_s27 = sphi %s1150_s27, %s1368_s27   ;;  %s1084_s26 = sphi %s1148_s26, %s1367_s26   ;;  %s1080_s25 = sphi %s1146_s25, %s1371_s25   ;;  %s1076_s24 = sphi %s1144_s24, %s1370_s24  }
   0xf   : > { %1352 = sst [smem:[#allocation20_spill]] %s1084_s26  ;;  %p723_p0 = scmp.ge.s32.totalorder %s1096_s29, 1 }
  0x10   : > { %1353 = sst [smem:[#allocation21_spill]] %s1092_s28  ;;  %p66_p1 = scmp.eq.s32.totalorder %s1175_s30, 0 }
  0x11   : > { %p242_p2 = scmp.lt.s32.totalorder %s1096_s29, 3  ;;  %s1354_s2 = sld [smem:[#allocation25_spill]] }
  0x12   : > { %s1098_s12 = smov [#allocation7]   ;;  %p726_p6 = scmp.ge.s32.totalorder %s1096_s29, 2 }
  0x13   : > { %p1183_p3 = pnand %p723_p0, %p242_p2  ;;  %s255_s13 = sshll.u32 %s1098_s12, 4  ;;  %s256_s13 = int_to_ptr.vmem [resolvable:$true] %s255_s13 }
  0x14   : > { %s1356_s4 = sld [smem:[#allocation26_spill]]  ;;  %s1099_s17 = smov 128  }
  0x15   : > { %p764_p4 = pneg %p1183_p3  ;;  %s1100_s18 = smov 8  }
  0x16   : > { %s1101_s19 = smov [#allocation8]   ;;  %s1102_s21 = smov 256  }
  0x17   : > { %s253_s10 = sshll.u32 %s1354_s2, 4  ;;  %p765_p5 = pnand %p764_p4, %p66_p1  ;;  %s254_s10 = int_to_ptr.hbm [resolvable:$true] %s253_s10 }
  0x18   : > { %s272_s20 = sshll.u32 %s1101_s19, 4  ;;  %s1103_s22 = smov 16   ;;  %s273_s20 = int_to_ptr.vmem [resolvable:$true] %s272_s20 }
  0x19   : > { %767 = dma.hbm_to_vmem [thread:$0]  (!%p765_p5), %s254_s10, 512, %s256_s13, [#allocation6], %s1099_s17, %s1099_s17, %s1100_s18  }
  0x1a   : > { %s270_s16 = sshll.u32 %s1356_s4, 4  ;;  %s722_s23 = sadd.s32 4294967294, %s1096_s29   ;;  %s271_s16 = int_to_ptr.hbm [resolvable:$true] %s270_s16 }
  0x1b   : > { %770 = dma.hbm_to_vmem [thread:$0]  (!%p765_p5), %s271_s16, 1024, %s273_s20, [#allocation9], %s1102_s21, %s1102_s21, %s1103_s22  }
  0x1c   : > { %s43_s8 = sadd.s32 1, %s1092_s28  ;;  %s52_s9 = sadd.s32 1, %s1084_s26 }
  0x1d   : > { %p45_p7 = scmp.ge.s32.totalorder %s43_s8, 2  ;;  %p59_p8 = scmp.ne.s32.totalorder %s1084_s26, %s1080_s25 }
  0x1e   : > { %p60_p9 = scmp.eq.s32.totalorder %s1096_s29, 0  ;;  %p65_p11 = scmp.ne.s32.totalorder %s1080_s25, %s1076_s24 }
  0x1f   : > { %s1373_s8 = smov (%p45_p7, %s43_s8), 0  ;;  %p201_p12 = scmp.eq.s32.totalorder %s1175_s30, 1 }
  0x20   : > { %1357 = sst [smem:[#allocation22_spill]] %s1373_s8  ;;  %p1203_p10 = por %p60_p9, %p59_p8 }
  0x21   : > { %s47_s12 = ssub.s32 %s1092_s28, %s1373_s8  ;;  %p1214_p0 = por %p66_p1, %p65_p11 }
  0x22   : > { %p50_p13 = scmp.eq.s32.totalorder %s47_s12, 0  ;;  %p1218_p2 = por %p201_p12, %p59_p8 }
  0x23   : > { %p207_p4 = scmp.eq.s32.totalorder %s722_s23, 1  ;;  %p787_p7 = scmp.lt.s32.totalorder %s1096_s29, 2 }
  0x24   : > { %s1223_s15 = scalar_select %p50_p13, %s1084_s26, %s52_s9  }
  0x25   : > { %p1225_p5 = por %p207_p4, %p65_p11  ;;  %s289_s17 = sand.u32 1, %s1084_s26  }
  0x26   : > { %1361 = sst [smem:[#allocation23_spill]] %s1223_s15  ;;  %s728_s18 = sshll.u32 %s1092_s28, 3 }
  0x27   : > { %s1362_s16 = scalar_select %p1225_p5, 1, 0 }
  0x28   : > { %s727_s19 = sshll.u32 %s289_s17, 3  ;;  %s298_s22 = scalar_lea.hbm %s1336_s0, %s728_s18 }
  0x29   : > { %1363 = sst [smem:[#allocation24_spill]] %s1362_s16  ;;  %s300_s12 = sshll.u32 %s298_s22, 4  ;;  %s301_s12 = int_to_ptr.hbm [resolvable:$true] %s300_s12 }
  0x2a   : > { %s293_s2 = scalar_lea.vmem [#allocation2], %s727_s19  ;;  %p772_p8 = pnand %p787_p7, %p1203_p10 }
  0x2b   : > { %s302_s4 = sshll.u32 %s293_s2, 4  ;;  %s317_s8 = scalar_lea.hbm %s1337_s1, %s728_s18  ;;  %s303_s4 = int_to_ptr.vmem [resolvable:$true] %s302_s4 }
  0x2c   : > { %s309_s15 = sand.u32 1, %s1096_s29   ;;  %s290_s16 = scalar_lea.sflag [#allocation3], %s289_s17 }
  0x2d   : > { %774 = dma.hbm_to_vmem [thread:$0]  (!%p772_p8), %s301_s12, 128, %s303_s4, %s290_s16  }
  0x2e   : > { %s319_s28 = sshll.u32 %s317_s8, 4  ;;  %s313_s26 = scalar_lea.vmem [#allocation5], %s727_s19  ;;  %s320_s28 = int_to_ptr.hbm [resolvable:$true] %s319_s28 }
  0x2f   : > { %s321_s24 = sshll.u32 %s313_s26, 4  ;;  %s310_s20 = scalar_lea.sflag [#allocation6], %s309_s15  ;;  %s322_s24 = int_to_ptr.vmem [resolvable:$true] %s321_s24 }
  0x30   : > { %777 = dma.hbm_to_vmem [thread:$0]  (!%p772_p8), %s320_s28, 128, %s322_s24, %s310_s20  }
  0x31   : > { %330 = sbr.rel (%p1183_p3) target bundleno = 732 (0x2dc), region = 44  ;;  %s1244_s2 = sand.u32 (!%p1183_p3), 1, %s1080_s25  }
  0x32   : > { %s1247_s10 = sshll.u32 (!%p1183_p3), %s1244_s2, 3  ;;  %s333_s4 = scalar_lea.sflag (!%p1183_p3), [#allocation3], %s1244_s2 }
  0x33   : > { %s336_s8 = scalar_lea.vmem (!%p1183_p3), [#allocation2], %s1247_s10 }
  0x36   : > { %1051 = dma.done.wait (%p1214_p0), %s333_s4, 128  }
  0x37   : > { %1053 = vsyncadd (%p1214_p0), %s333_s4, 4294967168  ;;  %s342_s24 = sand.u32 1, %s1175_s30   ;;  %s346_s28 = scalar_lea.vmem [#allocation5], %s1247_s10 }
  0x38   : > { %s343_s26 = scalar_lea.sflag [#allocation6], %s342_s24 }
  0x39   : > { %1055 = dma.done.wait (%p1214_p0), %s343_s26, 128  }
  0x3a   : > { %1057 = vsyncadd (%p1214_p0), %s343_s26, 4294967168 }
  0x3b   : > { %1059 = dma.done.wait (%p66_p1), [#allocation6], 512  }
  0x3c   : > { %1061 = vsyncadd (%p66_p1), [#allocation6], 4294966784 }
  0x3d   : > { %1063 = dma.done.wait (%p66_p1), [#allocation9], 1024  }
  0x3e   : > { %1065 = vsyncadd (%p66_p1), [#allocation9], 4294966272  ;;  %v405_v0 = vld [vmem:[#allocation7 + $0x10] sm:$0xff]  ;;  %v406_v1 = vld [vmem:[#allocation7 + $0x18] sm:$0xff]  ;;  %vm413_vm0 = vcmask 261120   ;;  %vm492_vm1 = vcmask 64512  }
  0x3f   : > { %v434_v2 = vld [vmem:[#allocation8 + $0x20] sm:$0xff]  ;;  %v408_v3 = vpack.c.bf16 %v406_v1, %v405_v0  ;;  %v436_v4 = vld [vmem:[#allocation8 + $0x30] sm:$0xff]  ;;  %v404_v6 = vld [vmem:[#allocation7 + $0x8] sm:$0xff]  ;;  %vm509_vm2 = vcmask 1043456   ;;  %s397_s16 = scalar_lea.vmem [#allocation11], %s1247_s10  ;;  %s744_s17 = sshll.u32 %s1088_s27, 3 }
  0x40   : > { %v403_v5 = vld [vmem:[#allocation7] sm:$0xff]  ;;  %v440_v7 = vpack.c.bf16 %v436_v4, %v434_v2  ;;  %v432_v9 = vld [vmem:[#allocation8 + $0x10] sm:$0xff]  ;;  %v435_v27 = vld [vmem:[#allocation8 + $0x28] sm:$0xff]  ;;  %s560_s21 = scalar_lea.hbm %s1343_s7, %s744_s17  ;;  %s562_s22 = sshll.u32 %s397_s16, 4  ;;  %s563_s22 = int_to_ptr.vmem [resolvable:$true] %s562_s22 }
  0x41   : > { %v430_v8 = vld [vmem:[#allocation8] sm:$0xff]  ;;  %423 = vmatpush.bf16.msra.mxu0 %v408_v3  ;;  %v407_v10 = vpack.c.bf16 %v404_v6, %v403_v5  ;;  %v401_v13 = vld [vmem:[%s346_s28] sm:$0xff]  ;;  %v431_v29 = vld [vmem:[#allocation8 + $0x8] sm:$0xff]  ;;  %s564_s12 = sshll.u32 %s560_s21, 4  ;;  %s534_s23 = scalar_lea.sflag [#allocation12], %s1244_s2  ;;  %s565_s12 = int_to_ptr.hbm [resolvable:$true] %s564_s12 }
  0x42   : > { %v399_v11 = vld [vmem:[%s336_s8] sm:$0xff]  ;;  %457 = vmatpush.bf16.msra.mxu1 %v440_v7  ;;  %v438_v12 = vpack.c.bf16 %v432_v9, %v430_v8  ;;  %v402_v15 = vpack.c.bf16 %v401_v13, %v401_v13  ;;  %v437_v28 = vld [vmem:[#allocation8 + $0x38] sm:$0xff]  ;;  %s984_s9 = sshra.s32 %s565_s12, 4  ;;  %s990_s27 = scalar_lea.hbm %s1343_s7, 16  ;;  %s985_s9 = int_to_ptr.hbm [resolvable:$true] %s984_s9 }
  0x43   : > { %v400_v14 = vpack.c.bf16 %v399_v11, %v399_v11  ;;  %v442_v16 = vld [vmem:[%s1341_s5] sm:$0x3]  ;;  %v441_v30 = vpack.c.bf16 %v437_v28, %v435_v27  ;;  %v433_v31 = vld [vmem:[#allocation8 + $0x18] sm:$0xff]  ;;  %s986_s20 = scalar_lea.hbm %s985_s9, 8  ;;  %p991_p10 = scmp.lt.s32.totalorder %s985_s9, %s1343_s7 }
  0x44   : > { %v444_v17 = vperm.slane %v442_v16, 0  ;;  %v845_v19 = vld [vmem:[%s1339_s3] ss:$0 sm:$0xff]  ;;  %v439_v32 = vpack.c.bf16 %v433_v31, %v431_v29  ;;  %v445_v36 = vperm.slane %v442_v16, 1  ;;  %p987_p1 = scmp.ne.s32.totalorder %s985_s9, %s986_s20  ;;  %p992_p11 = scmp.lt.s32.totalorder %s990_s27, %s986_s20 }
  0x45   : > { %424 = vmatpush.bf16.msra.mxu0 %v407_v10  ;;  %470 = vmatpush.bf16.msra.mxu2 %v441_v30 }
  0x46   : > { %458 = vmatpush.bf16.msra.mxu1 %v438_v12  ;;  %p988_p3 = pnand %p987_p1, %p1218_p2  ;;  %p993_p12 = por %p992_p11, %p991_p10 }
  0x48   : > { %738 = vmatmul.msk.bf16.vlgmr.msra.gmra.mxu0 %vm413_vm0, %v400_v14  ;;  %p989_p9 = pneg %p988_p3 }
  0x49   : > { %739 = vmatmul.msk.bf16.vlgmr.msra.gmra.mxu1 %vm413_vm0, %v402_v15  ;;  %471 = vmatpush.bf16.msra.mxu2 %v439_v32 }
  0x4a   : > { %p994_p13 = pnand %p993_p12, %p989_p9 }
  0x4c   : > { %740 = vmatmul.msk.bf16.vlgmr.msra.gmra.mxu2 %vm413_vm0, %v402_v15 }
  0xc5   : > { %v426_v18 = vpop.f32.mrf.mxu0 }
  0xc6   : > { %v460_v20 = vpop.f32.mrf.mxu1  ;;  %v427_v23 = vadd.f32 %v845_v19, %v426_v18 }
  0xc7   : > { %v461_v21 = vadd.f32 %v460_v20, %v444_v17 }
  0xc8   : > { %v477_v25 = vpack.c.bf16 %v427_v23, %v427_v23 }
  0xc9   : > { %v478_v22 = vpack.c.bf16 %v461_v21, %v461_v21 }
  0xcb   : > { %486 = vmatpush.bf16.xpose.msra.mxu3 %v478_v22 }
  0xcd   : > { %v428_v24 = vpop.f32.mrf.mxu0 }
  0xce   : > { %v462_v26 = vpop.f32.mrf.mxu1 }
  0xcf   : > { %v473_v38 = vpop.f32.mrf.mxu2 }
  0xd0   : > { %v474_v40 = vadd.f32 %v473_v38, %v445_v36 }
  0xd2   : > { %487 = vmatmul.bf16.vlgmr.msra.gmra.mxu3 %v477_v25  ;;  %v505_v42 = vpack.c.bf16 %v474_v40, %v474_v40 }
  0xd4   : > { %v511_v43 = vsel %vm509_vm2, %v505_v42, 0 }
  0xd5   : > { %520 = vmatpush.bf16.msrb.mxu0 %v511_v43 }
  0xd7   : > { %v475_v44 = vpop.f32.mrf.mxu2 }
 0x155   : > { %v488_v33 = vpop.f32.mrf.mxu3 }
 0x156   : > { %v493_v34 = vsel %vm492_vm1, %v488_v33, -inf }
 0x157   : > { %494 = vmax.xlane.f32.xlu0 %v493_v34 }
 0x15d   : > { %v490_v35 = vpop.f32.mrf.mxu3 }
 0x1ca   : > { %v495_v37 = vpop.xlane.xlu0 %494 }
 0x1cb   : > { %v496_v39 = vsub.f32 %v488_v33, %v495_v37 }
 0x1cd   : > { %v497_v41 = vmul.f32 1.442695, %v496_v39 }
 0x1cf   : > { %846 = vpow2.f32 %v497_v41 }
 0x1d5   : > { %v847_v45 = vpop.eup %846 }
 0x1d6   : > { %v499_v46 = vsel %vm492_vm1, %v847_v45, 0.0 }
 0x1d7   : > { %500 = vadd.xlane.f32.xlu0 %v499_v46 }
 0x24a   : > { %v501_v47 = vpop.xlane.xlu0 %500 }
 0x24b   : > { %848 = vrcp.f32 %v501_v47 }
 0x251   : > { %v849_v48 = vpop.eup %848 }
 0x252   : > { %v503_v49 = vmul.f32 %v849_v48, %v847_v45 }
 0x254   : > { %v504_v50 = vpack.c.bf16 %v503_v49, %v503_v49  ;;  %527 = vst.msk [vmem:[%s397_s16] sm:$0xff] %vm492_vm1, %v503_v49 }
 0x256   : > { %741 = vmatmul.msk.bf16.vlgmr.msrb.gmra.mxu0 %vm492_vm1, %v504_v50 }
 0x257   : > { %997 = shalt.err (!%p994_p13)
}
 0x258   : > { %761 = dma.vmem_to_hbm [thread:$0]  (%p1218_p2), %s563_s22, 128, %s565_s12, %s534_s23  }
 0x259   : > { %s545_s11 = scalar_lea.hbm %s1342_s6, %s744_s17  ;;  %s390_s13 = scalar_lea.vmem [#allocation10], %s1247_s10 }
 0x25a   : > { %s547_s15 = sshll.u32 %s390_s13, 4  ;;  %s549_s16 = sshll.u32 %s545_s11, 4  ;;  %s548_s15 = int_to_ptr.vmem [resolvable:$true] %s547_s15  ;;  %s550_s16 = int_to_ptr.hbm [resolvable:$true] %s549_s16 }
 0x25b   : > { %s529_s18 = scalar_lea.sflag [#allocation4], %s1244_s2  ;;  %s1012_s19 = sshra.s32 %s550_s16, 4  ;;  %s1013_s19 = int_to_ptr.hbm [resolvable:$true] %s1012_s19 }
 0x25c   : > { %s1014_s21 = scalar_lea.hbm %s1013_s19, 8  ;;  %s1018_s23 = scalar_lea.hbm %s1342_s6, 16 }
 0x25d   : > { %p1015_p0 = scmp.ne.s32.totalorder %s1013_s19, %s1014_s21  ;;  %p1019_p8 = scmp.lt.s32.totalorder %s1013_s19, %s1342_s6 }
 0x25e   : > { %p1020_p1 = scmp.lt.s32.totalorder %s1018_s23, %s1014_s21 }
 0x25f   : > { %p1016_p4 = pnand %p1015_p0, %p1218_p2 }
 0x260   : > { %p1021_p3 = por %p1020_p1, %p1019_p8 }
 0x261   : > { %p1017_p7 = pneg %p1016_p4 }
 0x263   : > { %p1022_p9 = pnand %p1021_p3, %p1017_p7 }
 0x2d3   : > { %v522_v51 = vpop.f32.mrf.mxu0 }
 0x2d4   : > { %526 = vst [vmem:[%s390_s13] sm:$0xff] %v522_v51 }
 0x2d5   : > { %1025 = shalt.err (!%p1022_p9)
}
 0x2d6   : > { %760 = dma.vmem_to_hbm [thread:$0]  (%p1218_p2), %s548_s15, 128, %s550_s16, %s529_s18  }
 0x2db   : > { %v524_v52 = vpop.f32.mrf.mxu0 }
 0x2dc PF: > { %s1364_s2 = sld [smem:[#allocation19_spill]]  ;;  %p779_p10 = pnand %p726_p6, %p1225_p5 }
 0x2de   : > { %p780_p11 = pneg %p779_p10 }
 0x2e2   : > { %s576_s20 = sand.u32 1, %s1364_s2  }
 0x2e3   : > { %s577_s4 = scalar_lea.sflag [#allocation4], %s576_s20 }
 0x2e4   : > { %1067 = dma.done.wait (%p780_p11), %s577_s4, 128  }
 0x2e5   : > { %1069 = vsyncadd (%p780_p11), %s577_s4, 4294967168  ;;  %s587_s8 = scalar_lea.sflag [#allocation12], %s576_s20 }
 0x2e6   : > { %1071 = dma.done.wait (%p780_p11), %s587_s8, 128  }
 0x2e7   : > { %1073 = vsyncadd (%p780_p11), %s587_s8, 4294967168  ;;  %s31_s29 = sadd.s32 1, %s1096_s29   ;;  %s1366_s14 = sld [smem:[#allocation20_spill]] }
 0x2e8   : > { %p28_p12 = scmp.ge.s32.totalorder %s31_s29, 4   ;;  %s1367_s26 = sld [smem:[#allocation23_spill]] }
 0x2e9   : > { %s1368_s27 = sld [smem:[#allocation21_spill]]  ;;  %s1370_s24 = smov %s1080_s25 }
 0x2ea   : > { %s1369_s28 = sld [smem:[#allocation22_spill]]  ;;  %30 = sbr.rel (!%p28_p12) target bundleno = 14 (0xe), region = 127 }
 0x2ed   : > { %s1371_s25 = smov %s1366_s14 }
 0x2ef   :  { %593 = vsyncpa [#allocation3], 1 }
 0x2f0   :  { %595 = vsyncpa [#allocation3 + $0x1], 1 }
 0x2f1   :  { %596 = vsyncpa [#allocation6], 1 }
 0x2f2   :  { %598 = vsyncpa [#allocation6 + $0x1], 1 }
 0x2f3   :  { %599 = vsyncpa [#allocation9], 1 }
 0x2f4   :  { %600 = vsyncpa [#allocation4], 1 }
 0x2f5   :  { %602 = vsyncpa [#allocation4 + $0x1], 1 }
 0x2f6   :  { %603 = vsyncpa [#allocation12], 1 }
 0x2f7   :  { %605 = vsyncpa [#allocation12 + $0x1], 1 }

</bundles_post_ra>
